<compile_context>
chip_gen: v5e
topology: v5e:2x2
jax: 0.10.0
libtpu: 0.0.40
codegen_flags: <defaults>
</compile_context>

<pallas_src>
import jax
import jax.numpy as jnp
from jax.experimental import pallas as pl
from jax.experimental.pallas import tpu as pltpu


_TARGET_BLOCK_ROWS = 2048        # ~1 MiB per f32 input block (rows x 128 lanes)


def _round_up(x, m):
    return (x + m - 1) // m * m


def _combiner_kernel(p_ref, e1_ref, e2_ref, out_ref):
    """One (block_rows, 128) tile of the interleaved embedding stream.

    Lane layout: flat index = 2*batch + feature, and 128 is even, so in every
    row even lanes hold feature 0 and odd lanes hold feature 1 of the same
    batch element.
    p_ref (SMEM f32[13]): [att1 W row-major (8), att1 b (2), att2 z1-z0 coeffs (3)].
    """
    e1 = e1_ref[...].astype(jnp.float32)
    e2 = e2_ref[...].astype(jnp.float32)

    lane = jax.lax.broadcasted_iota(jnp.int32, e1.shape, 1)
    is_f0 = (lane & 1) == 0                      # even lane -> feature 0

    # Partner feature of each lane (f1 next to f0 and vice versa).  Rolls ride
    # the XLU slot; the wrapped lanes (0 and 127) are never the selected branch.
    def partner(x):
        return jnp.where(is_f0,
                         pltpu.roll(x, shift=127, axis=1),   # == shift -1
                         pltpu.roll(x, shift=1, axis=1))

    e1p = partner(e1)
    e2p = partner(e2)

    # Lane-parity weight planes for att1 (built once per tile, amortized over
    # the whole block).  Even lanes see W1 columns (0,1,2,3), odd lanes the
    # feature-swapped order (1,0,3,2), so both lanes of a pair compute the
    # SAME h0/h1 value.
    def pick(a, b):
        return jnp.where(is_f0, p_ref[a], p_ref[b])

    h0 = jnp.maximum(pick(0, 1) * e1 + pick(1, 0) * e1p
                     + pick(2, 3) * e2 + pick(3, 2) * e2p + p_ref[8], 0.0)
    h1 = jnp.maximum(pick(4, 5) * e1 + pick(5, 4) * e1p
                     + pick(6, 7) * e2 + pick(7, 6) * e2p + p_ref[9], 0.0)

    # TODO(synk): training-mode dropout (p=0.5, stochastic) not implemented;
    # eval-mode identity is used here.

    # att2 folded into one logit difference, then the width-2 softmax in closed
    # form: a0 = softmax(z)[0] = 1 / (1 + exp(z1 - z0)).  exp -> EUP.
    dz = p_ref[10] * h0 + p_ref[11] * h1 + p_ref[12]
    a0 = 1.0 / (1.0 + jnp.exp(dz))

    # final = e1*a0 + e2*(1-a0).  a0 is identical in both lanes of a pair, so
    # the result lands directly in the interleaved (N,2) layout.
    out_ref[...] = (e2 + (e1 - e2) * a0).astype(out_ref.dtype)


def graph_combiner_forward(e1, e2, w1, b1, w2, b2):
    """Eval-mode graph_combiner forward given pre-computed embeddings.

    e1, e2: (N, 2) embeddings (any float dtype).  w1: (2, 4), b1: (2,),
    w2: (2, 2), b2: (2,) in PyTorch nn.Linear (out_features, in_features)
    layout.  Returns (N, 2) in the input dtype.
    """
    n, d = e1.shape
    assert d == 2, "graph_combiner's (N,D)*(N,D//2) broadcast requires embed_dim == 2"
    assert e2.shape == (n, d)
    out_dtype = e1.dtype

    # 13 SMEM scalars: att1 weights/bias + att2 folded into a logit difference.
    diff = jnp.stack([w2[1, 0] - w2[0, 0], w2[1, 1] - w2[0, 1], b2[1] - b2[0]])
    params = jnp.concatenate(
        [w1.reshape(-1), b1.reshape(-1), diff]).astype(jnp.float32)

    # Tile geometry: a flat interleaved stream of 2N values, 128 lanes wide,
    # rows a multiple of 8 -> every vreg fully dense, every store unmasked.
    flat_len = 2 * n
    rows = _round_up(max(pl.cdiv(flat_len, 128), 8), 8)
    nblk = max(1, pl.cdiv(rows, _TARGET_BLOCK_ROWS))
    if nblk == 1 and rows > 8:
        nblk = 2                       # >= 2 parallel steps feeds both v7x TCs
    block_rows = _round_up(pl.cdiv(rows, nblk), 8)
    padded_rows = nblk * block_rows
    total = padded_rows * 128

    def as_planes(e):
        f = e.reshape(-1)              # zero-copy: row-major (N,2) -> interleaved
        if total != flat_len:          # pad only up to the tile boundary
            f = jnp.pad(f, (0, total - flat_len))
        return f.reshape(padded_rows, 128)

    out = pl.pallas_call(
        _combiner_kernel,
        out_shape=jax.ShapeDtypeStruct((padded_rows, 128), out_dtype),
        grid=(nblk,),
        in_specs=[
            pl.BlockSpec(memory_space=pltpu.MemorySpace.SMEM),      # 13 scalars
            pl.BlockSpec((block_rows, 128), lambda i: (i, 0)),      # embedding1
            pl.BlockSpec((block_rows, 128), lambda i: (i, 0)),      # embedding2
        ],
        out_specs=pl.BlockSpec((block_rows, 128), lambda i: (i, 0)),
        compiler_params=pltpu.CompilerParams(
            dimension_semantics=("parallel",)),
    )(params, as_planes(e1), as_planes(e2))

    return out.reshape(-1)[:flat_len].reshape(n, d)


def _init_linear(key, fan_in, fan_out):
    """Deterministic nn.Linear-style init: U(-1/sqrt(fan_in), 1/sqrt(fan_in))."""
    kw, kb = jax.random.split(key)
    bound = 1.0 / (fan_in ** 0.5)
    w = jax.random.uniform(kw, (fan_out, fan_in), jnp.float32, -bound, bound)
    b = jax.random.uniform(kb, (fan_out,), jnp.float32, -bound, bound)
    return w, b


def _reference(e1, e2, w1, b1, w2, b2):
    """Plain-JAX eval-mode reference."""
    x = jnp.concatenate([e1, e2], axis=1)
    h = jnp.maximum(x @ w1.T + b1, 0.0)
    z = h @ w2.T + b2
    att = jax.nn.softmax(z, axis=1)
    return e1 * att[:, 0:1] + e2 * att[:, 1:2]


if __name__ == "__main__":
    EMBED_DIM = 2              # required by the module's broadcast semantics
    NUM_USERS, NUM_ITEMS = 50, 40

    key = jax.random.PRNGKey(0)
    k = jax.random.split(key, 8)

    # embedding1 / embedding2 are external submodules in the PyTorch module;
    # modeled here as synthetic user-table + item-table lookups (plain JAX).
    # TODO(synk): the table gather could be fused into the kernel (scalar
    # prefetch of nodes_u/nodes_i with tables in VMEM) to save one HBM round
    # trip; kept outside since the embeddings are opaque submodules.
    u_tab1 = jax.random.normal(k[0], (NUM_USERS, EMBED_DIM), jnp.float32)
    i_tab1 = jax.random.normal(k[1], (NUM_ITEMS, EMBED_DIM), jnp.float32)
    u_tab2 = jax.random.normal(k[2], (NUM_USERS, EMBED_DIM), jnp.float32)
    i_tab2 = jax.random.normal(k[3], (NUM_ITEMS, EMBED_DIM), jnp.float32)

    # att1: Linear(2*D -> D), att2: Linear(D -> D)  (PyTorch (out, in) layout)
    w1, b1 = _init_linear(k[4], 2 * EMBED_DIM, EMBED_DIM)
    w2, b2 = _init_linear(k[5], EMBED_DIM, EMBED_DIM)

    ok = True
    # batch=300: single-tile path with tail padding (2N not a multiple of 128);
    # batch=2500: exercises the >=2 parallel grid steps path.
    for batch in (300, 2500):
        ku, ki = jax.random.split(jax.random.fold_in(k[6], batch))
        nodes_u = jax.random.randint(ku, (batch,), 0, NUM_USERS)
        nodes_i = jax.random.randint(ki, (batch,), 0, NUM_ITEMS)

        e1 = u_tab1[nodes_u] + i_tab1[nodes_i]   # embedding1(nodes_u, nodes_i)
        e2 = u_tab2[nodes_u] + i_tab2[nodes_i]   # embedding2(nodes_u, nodes_i)

        out = jax.block_until_ready(
            graph_combiner_forward(e1, e2, w1, b1, w2, b2))
        expected = _reference(e1, e2, w1, b1, w2, b2)

        ok &= out.shape == (batch, EMBED_DIM)
        ok &= bool(jnp.allclose(out, expected, atol=1e-4, rtol=1e-4))

    assert ok
    print("KERNEL_OK")
</pallas_src>

<mosaic_0001>
module attributes {stable_mosaic.version = 11 : i64} {
  func.func @_combiner_kernel(%arg0: i32, %arg1: memref<13xf32, #tpu.memory_space<smem>>, %arg2: memref<8x128xf32, #tpu.memory_space<vmem>>, %arg3: memref<8x128xf32, #tpu.memory_space<vmem>>, %arg4: memref<8x128xf32, #tpu.memory_space<vmem>>) attributes {dimension_semantics = [#tpu.dimension_semantics<parallel>], iteration_bounds = array<i64: 1>, scalar_prefetch = 0 : i64, scratch_operands = 0 : i64, tpu.core_type = #tpu.core_type<tc>, window_params = [{transform_indices = @transform_0, window_bounds = array<i64: 13>}, {transform_indices = @transform_1, window_bounds = array<i64: 8, 128>}, {transform_indices = @transform_2, window_bounds = array<i64: 8, 128>}, {transform_indices = @transform_3, window_bounds = array<i64: 8, 128>}]} {
    %c0 = arith.constant 0 : index
    %c0_0 = arith.constant 0 : index
    %0 = vector.load %arg2[%c0, %c0_0] : memref<8x128xf32, #tpu.memory_space<vmem>>, vector<8x128xf32>
    %c0_1 = arith.constant 0 : index
    %c0_2 = arith.constant 0 : index
    %1 = vector.load %arg3[%c0_1, %c0_2] : memref<8x128xf32, #tpu.memory_space<vmem>>, vector<8x128xf32>
    %2 = tpu.iota {dimensions = array<i32: 1>} : vector<8x128xi32>
    %c1_i32 = arith.constant 1 : i32
    %3 = vector.broadcast %c1_i32 : i32 to vector<8x128xi32>
    %4 = arith.andi %2, %3 : vector<8x128xi32>
    %c0_i32 = arith.constant 0 : i32
    %5 = vector.broadcast %c0_i32 : i32 to vector<8x128xi32>
    %6 = arith.cmpi eq, %4, %5 : vector<8x128xi32>
    %c127_i32 = arith.constant 127 : i32
    %7 = tpu.dynamic_rotate %0 by %c127_i32 dim 1 : vector<8x128xf32>, i32 -> vector<8x128xf32>
    %c1_i32_3 = arith.constant 1 : i32
    %8 = tpu.dynamic_rotate %0 by %c1_i32_3 dim 1 : vector<8x128xf32>, i32 -> vector<8x128xf32>
    %9 = arith.select %6, %7, %8 : vector<8x128xi1>, vector<8x128xf32>
    %c127_i32_4 = arith.constant 127 : i32
    %10 = tpu.dynamic_rotate %1 by %c127_i32_4 dim 1 : vector<8x128xf32>, i32 -> vector<8x128xf32>
    %c1_i32_5 = arith.constant 1 : i32
    %11 = tpu.dynamic_rotate %1 by %c1_i32_5 dim 1 : vector<8x128xf32>, i32 -> vector<8x128xf32>
    %12 = arith.select %6, %10, %11 : vector<8x128xi1>, vector<8x128xf32>
    %c0_6 = arith.constant 0 : index
    %13 = memref.load %arg1[%c0_6] : memref<13xf32, #tpu.memory_space<smem>>
    %c1 = arith.constant 1 : index
    %14 = memref.load %arg1[%c1] : memref<13xf32, #tpu.memory_space<smem>>
    %15 = vector.broadcast %13 : f32 to vector<8x128xf32>
    %16 = vector.broadcast %14 : f32 to vector<8x128xf32>
    %17 = arith.select %6, %15, %16 : vector<8x128xi1>, vector<8x128xf32>
    %18 = arith.mulf %17, %0 : vector<8x128xf32>
    %c1_7 = arith.constant 1 : index
    %19 = memref.load %arg1[%c1_7] : memref<13xf32, #tpu.memory_space<smem>>
    %c0_8 = arith.constant 0 : index
    %20 = memref.load %arg1[%c0_8] : memref<13xf32, #tpu.memory_space<smem>>
    %21 = vector.broadcast %19 : f32 to vector<8x128xf32>
    %22 = vector.broadcast %20 : f32 to vector<8x128xf32>
    %23 = arith.select %6, %21, %22 : vector<8x128xi1>, vector<8x128xf32>
    %24 = arith.mulf %23, %9 : vector<8x128xf32>
    %25 = arith.addf %18, %24 : vector<8x128xf32>
    %c2 = arith.constant 2 : index
    %26 = memref.load %arg1[%c2] : memref<13xf32, #tpu.memory_space<smem>>
    %c3 = arith.constant 3 : index
    %27 = memref.load %arg1[%c3] : memref<13xf32, #tpu.memory_space<smem>>
    %28 = vector.broadcast %26 : f32 to vector<8x128xf32>
    %29 = vector.broadcast %27 : f32 to vector<8x128xf32>
    %30 = arith.select %6, %28, %29 : vector<8x128xi1>, vector<8x128xf32>
    %31 = arith.mulf %30, %1 : vector<8x128xf32>
    %32 = arith.addf %25, %31 : vector<8x128xf32>
    %c3_9 = arith.constant 3 : index
    %33 = memref.load %arg1[%c3_9] : memref<13xf32, #tpu.memory_space<smem>>
    %c2_10 = arith.constant 2 : index
    %34 = memref.load %arg1[%c2_10] : memref<13xf32, #tpu.memory_space<smem>>
    %35 = vector.broadcast %33 : f32 to vector<8x128xf32>
    %36 = vector.broadcast %34 : f32 to vector<8x128xf32>
    %37 = arith.select %6, %35, %36 : vector<8x128xi1>, vector<8x128xf32>
    %38 = arith.mulf %37, %12 : vector<8x128xf32>
    %39 = arith.addf %32, %38 : vector<8x128xf32>
    %c8 = arith.constant 8 : index
    %40 = memref.load %arg1[%c8] : memref<13xf32, #tpu.memory_space<smem>>
    %41 = vector.broadcast %40 : f32 to vector<8x128xf32>
    %42 = arith.addf %39, %41 : vector<8x128xf32>
    %cst = arith.constant 0.000000e+00 : f32
    %43 = vector.broadcast %cst : f32 to vector<8x128xf32>
    %44 = arith.maximumf %42, %43 : vector<8x128xf32>
    %c4 = arith.constant 4 : index
    %45 = memref.load %arg1[%c4] : memref<13xf32, #tpu.memory_space<smem>>
    %c5 = arith.constant 5 : index
    %46 = memref.load %arg1[%c5] : memref<13xf32, #tpu.memory_space<smem>>
    %47 = vector.broadcast %45 : f32 to vector<8x128xf32>
    %48 = vector.broadcast %46 : f32 to vector<8x128xf32>
    %49 = arith.select %6, %47, %48 : vector<8x128xi1>, vector<8x128xf32>
    %50 = arith.mulf %49, %0 : vector<8x128xf32>
    %c5_11 = arith.constant 5 : index
    %51 = memref.load %arg1[%c5_11] : memref<13xf32, #tpu.memory_space<smem>>
    %c4_12 = arith.constant 4 : index
    %52 = memref.load %arg1[%c4_12] : memref<13xf32, #tpu.memory_space<smem>>
    %53 = vector.broadcast %51 : f32 to vector<8x128xf32>
    %54 = vector.broadcast %52 : f32 to vector<8x128xf32>
    %55 = arith.select %6, %53, %54 : vector<8x128xi1>, vector<8x128xf32>
    %56 = arith.mulf %55, %9 : vector<8x128xf32>
    %57 = arith.addf %50, %56 : vector<8x128xf32>
    %c6 = arith.constant 6 : index
    %58 = memref.load %arg1[%c6] : memref<13xf32, #tpu.memory_space<smem>>
    %c7 = arith.constant 7 : index
    %59 = memref.load %arg1[%c7] : memref<13xf32, #tpu.memory_space<smem>>
    %60 = vector.broadcast %58 : f32 to vector<8x128xf32>
    %61 = vector.broadcast %59 : f32 to vector<8x128xf32>
    %62 = arith.select %6, %60, %61 : vector<8x128xi1>, vector<8x128xf32>
    %63 = arith.mulf %62, %1 : vector<8x128xf32>
    %64 = arith.addf %57, %63 : vector<8x128xf32>
    %c7_13 = arith.constant 7 : index
    %65 = memref.load %arg1[%c7_13] : memref<13xf32, #tpu.memory_space<smem>>
    %c6_14 = arith.constant 6 : index
    %66 = memref.load %arg1[%c6_14] : memref<13xf32, #tpu.memory_space<smem>>
    %67 = vector.broadcast %65 : f32 to vector<8x128xf32>
    %68 = vector.broadcast %66 : f32 to vector<8x128xf32>
    %69 = arith.select %6, %67, %68 : vector<8x128xi1>, vector<8x128xf32>
    %70 = arith.mulf %69, %12 : vector<8x128xf32>
    %71 = arith.addf %64, %70 : vector<8x128xf32>
    %c9 = arith.constant 9 : index
    %72 = memref.load %arg1[%c9] : memref<13xf32, #tpu.memory_space<smem>>
    %73 = vector.broadcast %72 : f32 to vector<8x128xf32>
    %74 = arith.addf %71, %73 : vector<8x128xf32>
    %cst_15 = arith.constant 0.000000e+00 : f32
    %75 = vector.broadcast %cst_15 : f32 to vector<8x128xf32>
    %76 = arith.maximumf %74, %75 : vector<8x128xf32>
    %c10 = arith.constant 10 : index
    %77 = memref.load %arg1[%c10] : memref<13xf32, #tpu.memory_space<smem>>
    %78 = vector.broadcast %77 : f32 to vector<8x128xf32>
    %79 = arith.mulf %78, %44 : vector<8x128xf32>
    %c11 = arith.constant 11 : index
    %80 = memref.load %arg1[%c11] : memref<13xf32, #tpu.memory_space<smem>>
    %81 = vector.broadcast %80 : f32 to vector<8x128xf32>
    %82 = arith.mulf %81, %76 : vector<8x128xf32>
    %83 = arith.addf %79, %82 : vector<8x128xf32>
    %c12 = arith.constant 12 : index
    %84 = memref.load %arg1[%c12] : memref<13xf32, #tpu.memory_space<smem>>
    %85 = vector.broadcast %84 : f32 to vector<8x128xf32>
    %86 = arith.addf %83, %85 : vector<8x128xf32>
    %87 = math.exp %86 : vector<8x128xf32>
    %cst_16 = arith.constant 1.000000e+00 : f32
    %88 = vector.broadcast %cst_16 : f32 to vector<8x128xf32>
    %89 = arith.addf %88, %87 : vector<8x128xf32>
    %cst_17 = arith.constant 1.000000e+00 : f32
    %90 = vector.broadcast %cst_17 : f32 to vector<8x128xf32>
    %91 = arith.divf %90, %89 : vector<8x128xf32>
    %92 = arith.subf %0, %1 : vector<8x128xf32>
    %93 = arith.mulf %92, %91 : vector<8x128xf32>
    %94 = arith.addf %1, %93 : vector<8x128xf32>
    %c0_18 = arith.constant 0 : index
    %c0_19 = arith.constant 0 : index
    %95 = vector.load %arg4[%c0_18, %c0_19] : memref<8x128xf32, #tpu.memory_space<vmem>>, vector<8x128xf32>
    tpu.vector_store %arg4[%c0_18, %c0_19], %94 {strides = array<i32>} : memref<8x128xf32, #tpu.memory_space<vmem>>, vector<8x128xf32>,
    return
  }
  func.func @transform_0(%arg0: i32) -> i32 {
    %c0_i32 = arith.constant 0 : i32
    %c0_i32_0 = arith.constant 0 : i32
    return %c0_i32 : i32
  }
  func.func @transform_1(%arg0: i32) -> (i32, i32) {
    %c0_i32 = arith.constant 0 : i32
    %c0_i32_0 = arith.constant 0 : i32
    return %arg0, %c0_i32 : i32, i32
  }
  func.func @transform_2(%arg0: i32) -> (i32, i32) {
    %c0_i32 = arith.constant 0 : i32
    %c0_i32_0 = arith.constant 0 : i32
    return %arg0, %c0_i32 : i32, i32
  }
  func.func @transform_3(%arg0: i32) -> (i32, i32) {
    %c0_i32 = arith.constant 0 : i32
    %c0_i32_0 = arith.constant 0 : i32
    return %arg0, %c0_i32 : i32, i32
  }
}

</mosaic_0001>

<bundles_post_ra>
// kernel: tpu_custom_call.1
= control target key start
LH: loop header
LB: loop body
LE: loop exit
PB: predicated region body
PF: predicated region fallthrough
CT: control target
= control target key end

     0   :  { %8 = vsyncpa [#allocation5], 0  ;;  %s375_s0 = inlined_call_operand.hbm [shape: f32[13], index: 0, kind: input, shape index: {}]   ;;  %s376_s1 = inlined_call_operand.hbm [shape: f32[8,128], index: 1, kind: input, shape index: {}]   ;;  %s377_s2 = inlined_call_operand.hbm [shape: f32[8,128], index: 2, kind: input, shape index: {}]   ;;  %s378_s3 = inlined_call_operand.hbm [shape: f32[8,128], index: 3, kind: output, shape index: {}]  }
   0x1   :  { %9 = vsyncpa [#allocation3], 0 }
   0x2   :  { %10 = vsyncpa [#allocation8], 0 }
   0x3   :  { %11 = vsyncpa [#allocation4], 0  ;;  %s17_s14 = sshll.u32 %s375_s0, 4  ;;  %s26_s17 = sshll.u32 %s376_s1, 4  ;;  %s18_s14 = int_to_ptr.hbm [resolvable:$true] %s17_s14  ;;  %s27_s17 = int_to_ptr.hbm [resolvable:$true] %s26_s17 }
   0x4   :  { %s283_s18 = smov [#allocation2]   ;;  %s284_s19 = smov [#allocation6]  }
   0x5   :  { %20 = dma.hbm_to_smem %s18_s14, 16, %s283_s18, [#allocation5]  }
   0x6   :  { %s28_s20 = sshll.u32 %s284_s19, 4  ;;  %s37_s23 = sshll.u32 %s377_s2, 4  ;;  %s29_s20 = int_to_ptr.vmem [resolvable:$true] %s28_s20  ;;  %s38_s23 = int_to_ptr.hbm [resolvable:$true] %s37_s23 }
   0x7   :  { %31 = dma.hbm_to_vmem [thread:$0]  %s27_s17, 128, %s29_s20, [#allocation3]  }
   0x8   :  { %s285_s24 = smov [#allocation7]  }
   0x9   :  { %s39_s25 = sshll.u32 %s285_s24, 4  ;;  %s40_s25 = int_to_ptr.vmem [resolvable:$true] %s39_s25 }
   0xa   :  { %42 = dma.hbm_to_vmem [thread:$0]  %s38_s23, 128, %s40_s25, [#allocation8]  }
   0xb   :  { %275 = dma.done.wait [#allocation5], 16  }
   0xc   :  { %276 = vsyncadd [#allocation5], 4294967280 }
   0xd   :  { %277 = dma.done.wait [#allocation3], 128  }
   0xe   :  { %278 = vsyncadd [#allocation3], 4294967168 }
   0xf   :  { %279 = dma.done.wait [#allocation8], 128  }
  0x10   :  { %280 = vsyncadd [#allocation8], 4294967168 }
  0x11   :  { %55 = sfence }
  0x12   :  { %v318_v0 = vld [vmem:[#allocation7] sm:$0xff]  ;;  %v320_v1 = vld [vmem:[#allocation6] sm:$0xff]  ;;  %s286_s0 = smov 127   ;;  %s287_s1 = smov 1   ;;  %v58_v2 = vlaneseq }
  0x13   :  { %67 = vrot.lane.b32.xlu1 %v318_v0, %s286_s0  ;;  %62 = vrot.lane.b32.xlu0 %v320_v1, %s286_s0  ;;  %s72_s2 = sld [smem:[#allocation2]]  ;;  %s288_s11 = smov [#allocation9]  }
  0x14   :  { %s169_s26 = sld [smem:[#allocation2 + $0x1]]  ;;  %v59_v3 = vand.u32 127, %v58_v2  ;;  %s155_s12 = sshll.u32 %s288_s11, 4  ;;  %s156_s12 = int_to_ptr.vmem [resolvable:$true] %s155_s12 }
  0x15   :  { %s173_s27 = sld [smem:[#allocation2 + $0x4]]  ;;  %s157_s15 = sshll.u32 %s378_s3, 4  ;;  %s158_s15 = int_to_ptr.hbm [resolvable:$true] %s157_s15 }
  0x16   :  { %s174_s28 = sld [smem:[#allocation2 + $0x5]]  ;;  %v60_v4 = vand.u32 1, %v59_v3  ;;  %v146_v3 = vsub.f32 %v320_v1, %v318_v0 }
  0x17   :  { %s326_s29 = sld [smem:[#allocation2 + $0x2]] }
  0x18   :  { %s328_s30 = sld [smem:[#allocation2 + $0x3]]  ;;  %vm334_vm0 = vcmp.eq.s32.totalorder %v60_v4, 0 }
  0x19   :  { %s330_s4 = sld [smem:[#allocation2 + $0x6]]  ;;  %v74_v8 = vstv %s72_s2 }
  0x1a   :  { %s332_s5 = sld [smem:[#allocation2 + $0x7]]  ;;  %v75_v9 = vstv %s169_s26 }
  0x1b   :  { %69 = vrot.lane.b32.xlu1 %v318_v0, %s287_s1  ;;  %64 = vrot.lane.b32.xlu0 %v320_v1, %s287_s1  ;;  %v97_v10 = vstv %s173_s27  ;;  %v76_v12 = vsel %vm334_vm0, %v74_v8, %v75_v9  ;;  %s346_s6 = sld [smem:[#allocation2 + $0x8]]  ;;  %v78_v20 = vsel %vm334_vm0, %v75_v9, %v74_v8 }
  0x1c   :  { %v98_v11 = vstv %s174_s28  ;;  %s177_s7 = sld [smem:[#allocation2 + $0x9]]  ;;  %v77_v24 = vmul.f32 %v76_v12, %v320_v1 }
  0x1d   :  { %v99_v13 = vsel %vm334_vm0, %v97_v10, %v98_v11  ;;  %v83_v14 = vstv %s326_s29  ;;  %v101_v21 = vsel %vm334_vm0, %v98_v11, %v97_v10  ;;  %s178_s8 = sld [smem:[#allocation2 + $0xa]] }
  0x1e   :  { %v84_v15 = vstv %s328_s30  ;;  %v100_v25 = vmul.f32 %v99_v13, %v320_v1  ;;  %s179_s9 = sld [smem:[#allocation2 + $0xb]] }
  0x1f   :  { %v106_v16 = vstv %s330_s4  ;;  %v85_v18 = vsel %vm334_vm0, %v83_v14, %v84_v15  ;;  %v88_v31 = vsel %vm334_vm0, %v84_v15, %v83_v14  ;;  %s180_s10 = sld [smem:[#allocation2 + $0xc]] }
  0x20   :  { %v107_v17 = vstv %s332_s5  ;;  %v86_v27 = vmul.f32 %v85_v18, %v318_v0 }
  0x21   :  { %v108_v19 = vsel %vm334_vm0, %v106_v16, %v107_v17  ;;  %v111_v32 = vsel %vm334_vm0, %v107_v17, %v106_v16  ;;  %v92_v40 = vstv %s346_s6 }
  0x22   :  { %v109_v28 = vmul.f32 %v108_v19, %v318_v0  ;;  %v115_v41 = vstv %s177_s7 }
  0x23   :  { %v119_v46 = vstv %s178_s8 }
  0x24   :  { %v122_v47 = vstv %s179_s9 }
  0x25   :  { %v126_v52 = vstv %s180_s10 }
  0x85   :  { %v68_v5 = vpop.permute.xlu1 %67  ;;  %v63_v6 = vpop.permute.xlu0 %62 }
  0x8d   :  { %v70_v22 = vpop.permute.xlu1 %69  ;;  %v65_v23 = vpop.permute.xlu0 %64 }
  0x8e   :  { %v66_v26 = vsel %vm334_vm0, %v63_v6, %v65_v23  ;;  %v71_v33 = vsel %vm334_vm0, %v68_v5, %v70_v22 }
  0x8f   :  { %v79_v29 = vmul.f32 %v78_v20, %v66_v26  ;;  %v102_v30 = vmul.f32 %v101_v21, %v66_v26  ;;  %v89_v36 = vmul.f32 %v88_v31, %v71_v33  ;;  %v112_v37 = vmul.f32 %v111_v32, %v71_v33 }
  0x91   :  { %v80_v34 = vadd.f32 %v79_v29, %v77_v24  ;;  %v103_v35 = vadd.f32 %v102_v30, %v100_v25 }
  0x93   :  { %v87_v38 = vadd.f32 %v86_v27, %v80_v34  ;;  %v110_v39 = vadd.f32 %v109_v28, %v103_v35 }
  0x95   :  { %v90_v42 = vadd.f32 %v89_v36, %v87_v38  ;;  %v113_v43 = vadd.f32 %v112_v37, %v110_v39 }
  0x97   :  { %v93_v44 = vadd.f32 %v92_v40, %v90_v42  ;;  %v116_v45 = vadd.f32 %v115_v41, %v113_v43 }
  0x99   :  { %v94_v48 = vmax.f32 %v93_v44, 0.0  ;;  %v117_v49 = vmax.f32 %v116_v45, 0.0 }
  0x9b   :  { %v120_v50 = vmul.f32 %v119_v46, %v94_v48  ;;  %v123_v51 = vmul.f32 %v122_v47, %v117_v49 }
  0x9d   :  { %v124_v53 = vadd.f32 %v123_v51, %v120_v50 }
  0x9f   :  { %v127_v54 = vadd.f32 %v126_v52, %v124_v53 }
  0xa1   :  { %v128_v55 = vmul.f32 1.442695, %v127_v54 }
  0xa3   :  { %187 = vpow2.f32 %v128_v55 }
  0xa9   :  { %v188_v56 = vpop.eup %187 }
  0xaa   :  { %v130_v57 = vadd.f32 1.0, %v188_v56 }
  0xac   :  { %189 = vrcp.f32 %v130_v57  ;;  %v142_v61 = vand.u32 2147483648, %v130_v57  ;;  %v140_v63 = vand.u32 2147483647, %v130_v57  ;;  %vm136_vm2 = vweird.f32 %v130_v57 }
  0xae   :  { %v143_v4 = vor.u32 1.1754944e-38, %v142_v61  ;;  %vm141_vm4 = vcmp.eq.f32.partialorder %v140_v63, 8.507059e+37 }
  0xb2   :  { %v190_v58 = vpop.eup %189 }
  0xb3   :  { %v132_v59 = vmul.f32 %v190_v58, %v130_v57  ;;  %vm137_vm1 = vweird.f32 %v190_v58 }
  0xb4   :  { %vm138_vm3 = vmor %vm136_vm2, %vm137_vm1 }
  0xb5   :  { %v133_v60 = vsub.f32 1.0, %v132_v59 }
  0xb7   :  { %v134_v62 = vmul.f32 %v190_v58, %v133_v60 }
  0xb9   :  { %v135_v2 = vadd.f32 %v190_v58, %v134_v62 }
  0xbb   :  { %v139_v5 = vsel %vm138_vm3, %v190_v58, %v135_v2 }
  0xbc   :  { %v144_v6 = vsel %vm141_vm4, %v143_v4, %v139_v5 }
  0xbd   :  { %v147_v7 = vmul.f32 %v146_v3, %v144_v6 }
  0xbf   :  { %v148_v8 = vadd.f32 %v147_v7, %v318_v0 }
  0xc1   :  { %149 = vst [vmem:[#allocation9] sm:$0xff] %v148_v8 }
  0xc2   :  { %160 = dma.vmem_to_hbm [thread:$0]  %s156_s12, 128, %s158_s15, [#allocation4]  }
  0xc3   :  { %281 = dma.done.wait [#allocation4], 128  }
  0xc4   :  { %282 = vsyncadd [#allocation4], 4294967168 }
  0xc5   :  { %165 = vsyncpa [#allocation3], 1 }
  0xc6   :  { %166 = vsyncpa [#allocation8], 1 }
  0xc7   :  { %167 = vsyncpa [#allocation4], 1 }
  0xc8   :  { %168 = vsyncpa [#allocation5], 1 }

</bundles_post_ra>
